<compile_context>
chip_gen: v7x
topology: tpu7x:2x2x1
jax: 0.10.0
libtpu: 0.0.40
codegen_flags: <defaults>
</compile_context>

<pallas_src>
import math

import numpy as np
import jax
import jax.numpy as jnp
from jax.experimental import pallas as pl
from jax.experimental.pallas import tpu as pltpu

KS = (1, 2, 3, 6)     # pyramid pool sizes (AdaptiveAvgPool2d targets)
KPAD = 6              # pad every level's pooled grid to 6x6
KK = KPAD * KPAD      # 36 pooled cells per level (zero-padded rows/cols are inert)


# ----------------------------------------------------------------------------
# Host-side constant construction (pool / bilinear-upsample linear operators)
# ----------------------------------------------------------------------------
def _pool_matrix(size, k, kpad=KPAD):
    """Rows i<k average the torch AdaptiveAvgPool bin [floor(i*S/k), ceil((i+1)*S/k))."""
    m = np.zeros((kpad, size), np.float32)
    for i in range(k):
        s = (i * size) // k
        e = ((i + 1) * size + k - 1) // k
        m[i, s:e] = 1.0 / (e - s)
    return m


def _upsample_matrix(size, k, kpad=KPAD):
    """Bilinear (align_corners=True) interpolation matrix from length-k to length-size."""
    u = np.zeros((size, kpad), np.float32)
    if k == 1:
        u[:, 0] = 1.0
    elif size == 1:                      # guard: output length 1 -> take position 0
        u[0, 0] = 1.0
    else:
        for h in range(size):
            pos = h * (k - 1) / (size - 1)
            i0 = int(math.floor(pos))
            i1 = min(i0 + 1, k - 1)
            w = pos - i0
            u[h, i0] += 1.0 - w
            u[h, i1] += w
    return u


def _pick_tile_hw(hw, max_tile=4096):
    """Largest multiple-of-128 divisor of hw that is <= max_tile, else full hw."""
    if hw <= max_tile or hw % 128 != 0:
        return hw
    best = hw
    for t in range(128, max_tile + 1, 128):
        if hw % t == 0:
            best = t
    return best


# ----------------------------------------------------------------------------
# Kernel A: adaptive-avg-pool (Kron matmul, accumulated over HW tiles)
#           + 1x1 conv (BN scale folded in) + bias + ReLU  ->  z (1, L, 36, Cout)
# ----------------------------------------------------------------------------
def pool_conv_kernel(x_ref, pk_ref, w_ref, b_ref, z_ref, acc_ref):
    n_levels = pk_ref.shape[0]
    t = pl.program_id(1)

    @pl.when(t == 0)
    def _init():
        acc_ref[...] = jnp.zeros_like(acc_ref)

    x = x_ref[0].astype(jnp.float32)                      # (TILE_HW, C)
    for idx in range(n_levels):                           # static unroll (4 levels)
        # partial pooled sums: (36, TILE_HW) @ (TILE_HW, C) -> (36, C)
        acc_ref[idx] += jnp.dot(pk_ref[idx], x, preferred_element_type=jnp.float32)

    @pl.when(t == pl.num_programs(1) - 1)
    def _finalize():
        for idx in range(n_levels):
            # 1x1 conv with BN scale pre-folded into w, then bias + ReLU.
            z = jnp.dot(acc_ref[idx], w_ref[idx], preferred_element_type=jnp.float32)
            z_ref[0, idx] = jnp.maximum(z + b_ref[idx], 0.0)   # (36, Cout)


# ----------------------------------------------------------------------------
# Kernel B: x passthrough + bilinear upsample (Kron matmul) with direct
#           channel-slice stores into the concatenated output.
# ----------------------------------------------------------------------------
def upsample_concat_kernel(x_ref, uk_ref, z_ref, o_ref):
    n_levels = z_ref.shape[1]
    c_in = x_ref.shape[-1]
    c_out = z_ref.shape[-1]

    # Passthrough channels [0:C] == x (plain copy, no concat materialization).
    o_ref[0, :, 0:c_in] = x_ref[0].astype(o_ref.dtype)

    for idx in range(n_levels):                           # static unroll (4 levels)
        # (TILE_HW, 36) @ (36, Cout) -> (TILE_HW, Cout); padded cells have zero cols.
        up = jnp.dot(uk_ref[idx], z_ref[0, idx], preferred_element_type=jnp.float32)
        c0 = c_in + idx * c_out
        o_ref[0, :, c0:c0 + c_out] = up.astype(o_ref.dtype)


# ----------------------------------------------------------------------------
# Wrappers
# ----------------------------------------------------------------------------
def pyramid_pooling_nhwc(x_nhwc, conv_w, bn_scale, bn_bias, *, tile_hw=None):
    """Native NHWC entry point (no layout transposes).

    x_nhwc:   (N, H, W, C)  f32 or bf16
    conv_w:   (4, C, C//4)  1x1 conv weights (no bias)
    bn_scale: (4, C//4)     folded eval-mode BN scale
    bn_bias:  (4, C//4)     folded eval-mode BN bias
    returns:  (N, H, W, C + 4*(C//4)), same dtype as x
    """
    N, H, W, C = x_nhwc.shape
    n_levels = len(KS)
    Cout = C // 4
    out_c = C + n_levels * Cout
    HW = H * W

    if tile_hw is None:
        tile_hw = _pick_tile_hw(HW)
    assert HW % tile_hw == 0 and (tile_hw % 128 == 0 or tile_hw == HW), (HW, tile_hw)
    n_tiles = HW // tile_hw

    x_flat = x_nhwc.reshape(N, HW, C)                     # contiguous reshape: free

    # Kronecker pool / upsample operators (zero rows/cols kill the 6x6 padding).
    pk = jnp.asarray(np.stack(
        [np.kron(_pool_matrix(H, k), _pool_matrix(W, k)) for k in KS]))        # (L, 36, HW)
    uk = jnp.asarray(np.stack(
        [np.kron(_upsample_matrix(H, k), _upsample_matrix(W, k)) for k in KS]))  # (L, HW, 36)

    # Fold BN scale into the conv weights; only the bias reaches the kernel.
    w_scaled = conv_w.astype(jnp.float32) * bn_scale.astype(jnp.float32)[:, None, :]  # (L,C,Cout)
    bias = bn_bias.astype(jnp.float32).reshape(n_levels, 1, Cout)

    it = jnp.dtype(x_nhwc.dtype).itemsize

    # ---- pass A: pooled + conv + BN + ReLU -> z ----
    est_a = (2 * (tile_hw * C * it + n_levels * KK * tile_hw * 4)
             + n_levels * C * Cout * 4 + n_levels * Cout * 4
             + 2 * n_levels * KK * Cout * 4 + n_levels * KK * C * 4)
    vmem_a = int(min(100 * 2**20, max(32 * 2**20, 2 * est_a)))

    z = pl.pallas_call(
        pool_conv_kernel,
        out_shape=jax.ShapeDtypeStruct((N, n_levels, KK, Cout), jnp.float32),
        grid=(N, n_tiles),
        in_specs=[
            pl.BlockSpec((1, tile_hw, C), lambda n, t: (n, t, 0)),
            pl.BlockSpec((n_levels, KK, tile_hw), lambda n, t: (0, 0, t)),
            pl.BlockSpec((n_levels, C, Cout), lambda n, t: (0, 0, 0)),
            pl.BlockSpec((n_levels, 1, Cout), lambda n, t: (0, 0, 0)),
        ],
        out_specs=pl.BlockSpec((1, n_levels, KK, Cout), lambda n, t: (n, 0, 0, 0)),
        scratch_shapes=[pltpu.VMEM((n_levels, KK, C), jnp.float32)],
        compiler_params=pltpu.CompilerParams(
            dimension_semantics=("parallel", "arbitrary"),
            vmem_limit_bytes=vmem_a),
    )(x_flat, pk, w_scaled, bias)

    # ---- pass B: passthrough + upsample + concat-by-slice-stores ----
    est_b = 2 * (tile_hw * C * it + n_levels * tile_hw * KK * 4
                 + n_levels * KK * Cout * 4 + tile_hw * out_c * it)
    vmem_b = int(min(100 * 2**20, max(32 * 2**20, 2 * est_b)))

    out_flat = pl.pallas_call(
        upsample_concat_kernel,
        out_shape=jax.ShapeDtypeStruct((N, HW, out_c), x_nhwc.dtype),
        grid=(N, n_tiles),
        in_specs=[
            pl.BlockSpec((1, tile_hw, C), lambda n, t: (n, t, 0)),
            pl.BlockSpec((n_levels, tile_hw, KK), lambda n, t: (0, t, 0)),
            pl.BlockSpec((1, n_levels, KK, Cout), lambda n, t: (n, 0, 0, 0)),
        ],
        out_specs=pl.BlockSpec((1, tile_hw, out_c), lambda n, t: (n, t, 0)),
        compiler_params=pltpu.CompilerParams(
            dimension_semantics=("parallel", "parallel"),
            vmem_limit_bytes=vmem_b),
    )(x_flat, uk, z)

    return out_flat.reshape(N, H, W, out_c)


def pyramid_pooling(x_nchw, conv_w, bn_scale, bn_bias, *, tile_hw=None):
    """NCHW compatibility wrapper matching the PyTorch module interface.

    Prefer pyramid_pooling_nhwc in an end-to-end NHWC pipeline: the two
    transposes here are full extra HBM read+writes at the memory-bound roofline.
    """
    x_nhwc = jnp.transpose(x_nchw, (0, 2, 3, 1))
    out = pyramid_pooling_nhwc(x_nhwc, conv_w, bn_scale, bn_bias, tile_hw=tile_hw)
    return jnp.transpose(out, (0, 3, 1, 2))


# ----------------------------------------------------------------------------
# Pure-JAX reference (NCHW, direct slicing/gather — no pool matrices)
# ----------------------------------------------------------------------------
def ref_pyramid_pooling(x, conv_w, bn_scale, bn_bias):
    N, C, H, W = x.shape
    Cout = C // 4
    feats = [x]
    for idx, k in enumerate(KS):
        rows = []
        for i in range(k):
            ys, ye = (i * H) // k, ((i + 1) * H + k - 1) // k
            cols = []
            for j in range(k):
                xs, xe = (j * W) // k, ((j + 1) * W + k - 1) // k
                cols.append(jnp.mean(x[:, :, ys:ye, xs:xe], axis=(2, 3)))
            rows.append(jnp.stack(cols, axis=-1))                     # (N, C, k)
        pooled = jnp.stack(rows, axis=-2)                             # (N, C, k, k)

        z = jnp.einsum('nchw,co->nohw', pooled, conv_w[idx])
        z = z * bn_scale[idx][None, :, None, None] + bn_bias[idx][None, :, None, None]
        z = jnp.maximum(z, 0.0)                                       # (N, Cout, k, k)

        if k == 1:
            up = jnp.broadcast_to(z, (N, Cout, H, W))
        else:
            ph = jnp.arange(H) * (k - 1) / (H - 1)
            pw = jnp.arange(W) * (k - 1) / (W - 1)
            y0 = jnp.floor(ph).astype(jnp.int32); y1 = jnp.minimum(y0 + 1, k - 1); wy = ph - y0
            x0 = jnp.floor(pw).astype(jnp.int32); x1 = jnp.minimum(x0 + 1, k - 1); wx = pw - x0

            def gather(yi, xi):
                return z[:, :, yi, :][:, :, :, xi]                    # (N, Cout, H, W)

            wy_ = wy[None, None, :, None]
            wx_ = wx[None, None, None, :]
            up = ((1 - wy_) * (1 - wx_) * gather(y0, x0)
                  + (1 - wy_) * wx_ * gather(y0, x1)
                  + wy_ * (1 - wx_) * gather(y1, x0)
                  + wy_ * wx_ * gather(y1, x1))
        feats.append(up)
    return jnp.concatenate(feats, axis=1)


if __name__ == "__main__":
    key = jax.random.PRNGKey(0)
    N, C, H, W = 2, 8, 16, 16          # in_channels=8 -> out_channels=2 per branch
    Cout = C // 4

    kx, kw, kg, kb, km, kv = jax.random.split(key, 6)
    x = jax.random.normal(kx, (N, C, H, W), jnp.float32)
    conv_w = 0.1 * jax.random.normal(kw, (4, C, Cout), jnp.float32)   # 1x1 conv weights, no bias

    # Deterministic BatchNorm params (eval mode), folded into scale/bias.
    gamma = 1.0 + 0.1 * jax.random.normal(kg, (4, Cout), jnp.float32)
    beta = 0.1 * jax.random.normal(kb, (4, Cout), jnp.float32)
    running_mean = 0.1 * jax.random.normal(km, (4, Cout), jnp.float32)
    running_var = jnp.abs(jax.random.normal(kv, (4, Cout), jnp.float32)) + 0.5
    eps = 1e-5
    bn_scale = gamma / jnp.sqrt(running_var + eps)
    bn_bias = beta - running_mean * bn_scale

    ref = ref_pyramid_pooling(x, conv_w, bn_scale, bn_bias)

    # f32 I/O; tile_hw=128 exercises the spatially-tiled (multi HW-tile) path.
    out = jax.block_until_ready(
        pyramid_pooling(x, conv_w, bn_scale, bn_bias, tile_hw=128))
    assert out.shape == (N, 2 * C, H, W), out.shape
    np.testing.assert_allclose(np.asarray(out), np.asarray(ref), rtol=1e-4, atol=1e-4)

    # bf16 I/O path (halves HBM traffic; accumulation stays f32 in-kernel).
    out_bf16 = jax.block_until_ready(
        pyramid_pooling(x.astype(jnp.bfloat16), conv_w, bn_scale, bn_bias, tile_hw=128))
    assert out_bf16.dtype == jnp.bfloat16, out_bf16.dtype
    np.testing.assert_allclose(np.asarray(out_bf16.astype(jnp.float32)), np.asarray(ref),
                               rtol=3e-2, atol=3e-2)

    print("KERNEL_OK")
</pallas_src>

<mosaic_0001>
module attributes {stable_mosaic.version = 11 : i64} {
  func.func @pool_conv_kernel(%arg0: i32, %arg1: i32, %arg2: memref<1x128x8xf32, #tpu.memory_space<vmem>>, %arg3: memref<4x36x128xf32, #tpu.memory_space<vmem>>, %arg4: memref<4x8x2xf32, #tpu.memory_space<vmem>>, %arg5: memref<4x1x2xf32, #tpu.memory_space<vmem>>, %arg6: memref<1x4x36x2xf32, #tpu.memory_space<vmem>>, %arg7: memref<4x36x8xf32, #tpu.memory_space<vmem>>) attributes {dimension_semantics = [#tpu.dimension_semantics<parallel>, #tpu.dimension_semantics<arbitrary>], iteration_bounds = array<i64: 2, 2>, scalar_prefetch = 0 : i64, scratch_operands = 1 : i64, tpu.core_type = #tpu.core_type<tc>, window_params = [{transform_indices = @transform_0, window_bounds = array<i64: 1, 128, 8>}, {transform_indices = @transform_1, window_bounds = array<i64: 4, 36, 128>}, {pipeline_mode = #tpu.pipeline_mode<synchronous>, transform_indices = @transform_2, window_bounds = array<i64: 4, 8, 2>}, {pipeline_mode = #tpu.pipeline_mode<synchronous>, transform_indices = @transform_3, window_bounds = array<i64: 4, 1, 2>}, {transform_indices = @transform_4, window_bounds = array<i64: 1, 4, 36, 2>}]} {
    %c0_i32 = arith.constant 0 : i32
    %0 = arith.cmpi eq, %arg1, %c0_i32 : i32
    %1 = arith.extui %0 : i1 to i32
    %c0_i32_0 = arith.constant 0 : i32
    %2 = arith.cmpi ne, %1, %c0_i32_0 : i32
    scf.if %2 {
      %cst_40 = arith.constant 0.000000e+00 : f32
      %44 = vector.broadcast %cst_40 : f32 to vector<4x36x8xf32>
      %c0_41 = arith.constant 0 : index
      %c0_42 = arith.constant 0 : index
      %c0_43 = arith.constant 0 : index
      %45 = vector.load %arg7[%c0_41, %c0_42, %c0_43] : memref<4x36x8xf32, #tpu.memory_space<vmem>>, vector<4x36x8xf32>
      tpu.vector_store %arg7[%c0_41, %c0_42, %c0_43], %44 {strides = array<i32>} : memref<4x36x8xf32, #tpu.memory_space<vmem>>, vector<4x36x8xf32>,
    } else {
    }
    %c0 = arith.constant 0 : index
    %c0_1 = arith.constant 0 : index
    %c0_2 = arith.constant 0 : index
    %3 = vector.load %arg2[%c0, %c0_1, %c0_2] : memref<1x128x8xf32, #tpu.memory_space<vmem>>, vector<1x128x8xf32>
    %4 = vector.shape_cast %3 : vector<1x128x8xf32> to vector<128x8xf32>
    %c0_3 = arith.constant 0 : index
    %c0_4 = arith.constant 0 : index
    %c0_5 = arith.constant 0 : index
    %5 = vector.load %arg7[%c0_3, %c0_4, %c0_5] : memref<4x36x8xf32, #tpu.memory_space<vmem>>, vector<1x36x8xf32>
    %6 = vector.shape_cast %5 : vector<1x36x8xf32> to vector<36x8xf32>
    %c0_6 = arith.constant 0 : index
    %c0_7 = arith.constant 0 : index
    %c0_8 = arith.constant 0 : index
    %7 = vector.load %arg3[%c0_6, %c0_7, %c0_8] : memref<4x36x128xf32, #tpu.memory_space<vmem>>, vector<1x36x128xf32>
    %8 = vector.shape_cast %7 : vector<1x36x128xf32> to vector<36x128xf32>
    %cst = arith.constant dense<0.000000e+00> : vector<36x8xf32>
    %9 = tpu.matmul %8, %4, %cst {dimension_numbers = #tpu.dot_dimension_numbers<[1], [0], [0], [1], [0, 0, 1, 1], [], []>} : vector<36x128xf32>, vector<128x8xf32>, vector<36x8xf32> -> vector<36x8xf32>
    %10 = arith.addf %6, %9 : vector<36x8xf32>
    %c0_9 = arith.constant 0 : index
    %c0_10 = arith.constant 0 : index
    %c0_11 = arith.constant 0 : index
    %11 = vector.load %arg7[%c0_9, %c0_10, %c0_11] : memref<4x36x8xf32, #tpu.memory_space<vmem>>, vector<1x36x8xf32>
    %12 = vector.shape_cast %11 : vector<1x36x8xf32> to vector<36x8xf32>
    %13 = vector.shape_cast %10 : vector<36x8xf32> to vector<1x36x8xf32>
    tpu.vector_store %arg7[%c0_9, %c0_10, %c0_11], %13 {strides = array<i32>} : memref<4x36x8xf32, #tpu.memory_space<vmem>>, vector<1x36x8xf32>,
    %c1 = arith.constant 1 : index
    %c0_12 = arith.constant 0 : index
    %c0_13 = arith.constant 0 : index
    %14 = vector.load %arg7[%c1, %c0_12, %c0_13] : memref<4x36x8xf32, #tpu.memory_space<vmem>>, vector<1x36x8xf32>
    %15 = vector.shape_cast %14 : vector<1x36x8xf32> to vector<36x8xf32>
    %c1_14 = arith.constant 1 : index
    %c0_15 = arith.constant 0 : index
    %c0_16 = arith.constant 0 : index
    %16 = vector.load %arg3[%c1_14, %c0_15, %c0_16] : memref<4x36x128xf32, #tpu.memory_space<vmem>>, vector<1x36x128xf32>
    %17 = vector.shape_cast %16 : vector<1x36x128xf32> to vector<36x128xf32>
    %cst_17 = arith.constant dense<0.000000e+00> : vector<36x8xf32>
    %18 = tpu.matmul %17, %4, %cst_17 {dimension_numbers = #tpu.dot_dimension_numbers<[1], [0], [0], [1], [0, 0, 1, 1], [], []>} : vector<36x128xf32>, vector<128x8xf32>, vector<36x8xf32> -> vector<36x8xf32>
    %19 = arith.addf %15, %18 : vector<36x8xf32>
    %c1_18 = arith.constant 1 : index
    %c0_19 = arith.constant 0 : index
    %c0_20 = arith.constant 0 : index
    %20 = vector.load %arg7[%c1_18, %c0_19, %c0_20] : memref<4x36x8xf32, #tpu.memory_space<vmem>>, vector<1x36x8xf32>
    %21 = vector.shape_cast %20 : vector<1x36x8xf32> to vector<36x8xf32>
    %22 = vector.shape_cast %19 : vector<36x8xf32> to vector<1x36x8xf32>
    tpu.vector_store %arg7[%c1_18, %c0_19, %c0_20], %22 {strides = array<i32>} : memref<4x36x8xf32, #tpu.memory_space<vmem>>, vector<1x36x8xf32>,
    %c2 = arith.constant 2 : index
    %c0_21 = arith.constant 0 : index
    %c0_22 = arith.constant 0 : index
    %23 = vector.load %arg7[%c2, %c0_21, %c0_22] : memref<4x36x8xf32, #tpu.memory_space<vmem>>, vector<1x36x8xf32>
    %24 = vector.shape_cast %23 : vector<1x36x8xf32> to vector<36x8xf32>
    %c2_23 = arith.constant 2 : index
    %c0_24 = arith.constant 0 : index
    %c0_25 = arith.constant 0 : index
    %25 = vector.load %arg3[%c2_23, %c0_24, %c0_25] : memref<4x36x128xf32, #tpu.memory_space<vmem>>, vector<1x36x128xf32>
    %26 = vector.shape_cast %25 : vector<1x36x128xf32> to vector<36x128xf32>
    %cst_26 = arith.constant dense<0.000000e+00> : vector<36x8xf32>
    %27 = tpu.matmul %26, %4, %cst_26 {dimension_numbers = #tpu.dot_dimension_numbers<[1], [0], [0], [1], [0, 0, 1, 1], [], []>} : vector<36x128xf32>, vector<128x8xf32>, vector<36x8xf32> -> vector<36x8xf32>
    %28 = arith.addf %24, %27 : vector<36x8xf32>
    %c2_27 = arith.constant 2 : index
    %c0_28 = arith.constant 0 : index
    %c0_29 = arith.constant 0 : index
    %29 = vector.load %arg7[%c2_27, %c0_28, %c0_29] : memref<4x36x8xf32, #tpu.memory_space<vmem>>, vector<1x36x8xf32>
    %30 = vector.shape_cast %29 : vector<1x36x8xf32> to vector<36x8xf32>
    %31 = vector.shape_cast %28 : vector<36x8xf32> to vector<1x36x8xf32>
    tpu.vector_store %arg7[%c2_27, %c0_28, %c0_29], %31 {strides = array<i32>} : memref<4x36x8xf32, #tpu.memory_space<vmem>>, vector<1x36x8xf32>,
    %c3 = arith.constant 3 : index
    %c0_30 = arith.constant 0 : index
    %c0_31 = arith.constant 0 : index
    %32 = vector.load %arg7[%c3, %c0_30, %c0_31] : memref<4x36x8xf32, #tpu.memory_space<vmem>>, vector<1x36x8xf32>
    %33 = vector.shape_cast %32 : vector<1x36x8xf32> to vector<36x8xf32>
    %c3_32 = arith.constant 3 : index
    %c0_33 = arith.constant 0 : index
    %c0_34 = arith.constant 0 : index
    %34 = vector.load %arg3[%c3_32, %c0_33, %c0_34] : memref<4x36x128xf32, #tpu.memory_space<vmem>>, vector<1x36x128xf32>
    %35 = vector.shape_cast %34 : vector<1x36x128xf32> to vector<36x128xf32>
    %cst_35 = arith.constant dense<0.000000e+00> : vector<36x8xf32>
    %36 = tpu.matmul %35, %4, %cst_35 {dimension_numbers = #tpu.dot_dimension_numbers<[1], [0], [0], [1], [0, 0, 1, 1], [], []>} : vector<36x128xf32>, vector<128x8xf32>, vector<36x8xf32> -> vector<36x8xf32>
    %37 = arith.addf %33, %36 : vector<36x8xf32>
    %c3_36 = arith.constant 3 : index
    %c0_37 = arith.constant 0 : index
    %c0_38 = arith.constant 0 : index
    %38 = vector.load %arg7[%c3_36, %c0_37, %c0_38] : memref<4x36x8xf32, #tpu.memory_space<vmem>>, vector<1x36x8xf32>
    %39 = vector.shape_cast %38 : vector<1x36x8xf32> to vector<36x8xf32>
    %40 = vector.shape_cast %37 : vector<36x8xf32> to vector<1x36x8xf32>
    tpu.vector_store %arg7[%c3_36, %c0_37, %c0_38], %40 {strides = array<i32>} : memref<4x36x8xf32, #tpu.memory_space<vmem>>, vector<1x36x8xf32>,
    %c1_i32 = arith.constant 1 : i32
    %41 = arith.cmpi eq, %arg1, %c1_i32 : i32
    %42 = arith.extui %41 : i1 to i32
    %c0_i32_39 = arith.constant 0 : i32
    %43 = arith.cmpi ne, %42, %c0_i32_39 : i32
    scf.if %43 {
      %c0_40 = arith.constant 0 : index
      %c0_41 = arith.constant 0 : index
      %c0_42 = arith.constant 0 : index
      %44 = vector.load %arg7[%c0_40, %c0_41, %c0_42] : memref<4x36x8xf32, #tpu.memory_space<vmem>>, vector<1x36x8xf32>
      %45 = vector.shape_cast %44 : vector<1x36x8xf32> to vector<36x8xf32>
      %c0_43 = arith.constant 0 : index
      %c0_44 = arith.constant 0 : index
      %c0_45 = arith.constant 0 : index
      %46 = vector.load %arg4[%c0_43, %c0_44, %c0_45] : memref<4x8x2xf32, #tpu.memory_space<vmem>>, vector<1x8x2xf32>
      %47 = vector.shape_cast %46 : vector<1x8x2xf32> to vector<8x2xf32>
      %cst_46 = arith.constant dense<0.000000e+00> : vector<36x2xf32>
      %48 = tpu.matmul %45, %47, %cst_46 {dimension_numbers = #tpu.dot_dimension_numbers<[1], [0], [0], [1], [0, 0, 1, 1], [], []>} : vector<36x8xf32>, vector<8x2xf32>, vector<36x2xf32> -> vector<36x2xf32>
      %c0_47 = arith.constant 0 : index
      %c0_48 = arith.constant 0 : index
      %c0_49 = arith.constant 0 : index
      %49 = vector.load %arg5[%c0_47, %c0_48, %c0_49] : memref<4x1x2xf32, #tpu.memory_space<vmem>>, vector<1x1x2xf32>
      %50 = vector.shape_cast %49 : vector<1x1x2xf32> to vector<1x2xf32>
      %51 = vector.broadcast %50 : vector<1x2xf32> to vector<36x2xf32>
      %52 = arith.addf %48, %51 : vector<36x2xf32>
      %cst_50 = arith.constant 0.000000e+00 : f32
      %53 = vector.broadcast %cst_50 : f32 to vector<36x2xf32>
      %54 = arith.maximumf %52, %53 : vector<36x2xf32>
      %c0_51 = arith.constant 0 : index
      %c0_52 = arith.constant 0 : index
      %c0_53 = arith.constant 0 : index
      %c0_54 = arith.constant 0 : index
      %55 = vector.load %arg6[%c0_51, %c0_52, %c0_53, %c0_54] : memref<1x4x36x2xf32, #tpu.memory_space<vmem>>, vector<1x1x36x2xf32>
      %56 = vector.shape_cast %55 : vector<1x1x36x2xf32> to vector<36x2xf32>
      %57 = vector.shape_cast %54 : vector<36x2xf32> to vector<1x1x36x2xf32>
      tpu.vector_store %arg6[%c0_51, %c0_52, %c0_53, %c0_54], %57 {strides = array<i32>} : memref<1x4x36x2xf32, #tpu.memory_space<vmem>>, vector<1x1x36x2xf32>,
      %c1_55 = arith.constant 1 : index
      %c0_56 = arith.constant 0 : index
      %c0_57 = arith.constant 0 : index
      %58 = vector.load %arg7[%c1_55, %c0_56, %c0_57] : memref<4x36x8xf32, #tpu.memory_space<vmem>>, vector<1x36x8xf32>
      %59 = vector.shape_cast %58 : vector<1x36x8xf32> to vector<36x8xf32>
      %c1_58 = arith.constant 1 : index
      %c0_59 = arith.constant 0 : index
      %c0_60 = arith.constant 0 : index
      %60 = vector.load %arg4[%c1_58, %c0_59, %c0_60] : memref<4x8x2xf32, #tpu.memory_space<vmem>>, vector<1x8x2xf32>
      %61 = vector.shape_cast %60 : vector<1x8x2xf32> to vector<8x2xf32>
      %cst_61 = arith.constant dense<0.000000e+00> : vector<36x2xf32>
      %62 = tpu.matmul %59, %61, %cst_61 {dimension_numbers = #tpu.dot_dimension_numbers<[1], [0], [0], [1], [0, 0, 1, 1], [], []>} : vector<36x8xf32>, vector<8x2xf32>, vector<36x2xf32> -> vector<36x2xf32>
      %c1_62 = arith.constant 1 : index
      %c0_63 = arith.constant 0 : index
      %c0_64 = arith.constant 0 : index
      %63 = vector.load %arg5[%c1_62, %c0_63, %c0_64] : memref<4x1x2xf32, #tpu.memory_space<vmem>>, vector<1x1x2xf32>
      %64 = vector.shape_cast %63 : vector<1x1x2xf32> to vector<1x2xf32>
      %65 = vector.broadcast %64 : vector<1x2xf32> to vector<36x2xf32>
      %66 = arith.addf %62, %65 : vector<36x2xf32>
      %cst_65 = arith.constant 0.000000e+00 : f32
      %67 = vector.broadcast %cst_65 : f32 to vector<36x2xf32>
      %68 = arith.maximumf %66, %67 : vector<36x2xf32>
      %c0_66 = arith.constant 0 : index
      %c1_67 = arith.constant 1 : index
      %c0_68 = arith.constant 0 : index
      %c0_69 = arith.constant 0 : index
      %69 = vector.load %arg6[%c0_66, %c1_67, %c0_68, %c0_69] : memref<1x4x36x2xf32, #tpu.memory_space<vmem>>, vector<1x1x36x2xf32>
      %70 = vector.shape_cast %69 : vector<1x1x36x2xf32> to vector<36x2xf32>
      %71 = vector.shape_cast %68 : vector<36x2xf32> to vector<1x1x36x2xf32>
      tpu.vector_store %arg6[%c0_66, %c1_67, %c0_68, %c0_69], %71 {strides = array<i32>} : memref<1x4x36x2xf32, #tpu.memory_space<vmem>>, vector<1x1x36x2xf32>,
      %c2_70 = arith.constant 2 : index
      %c0_71 = arith.constant 0 : index
      %c0_72 = arith.constant 0 : index
      %72 = vector.load %arg7[%c2_70, %c0_71, %c0_72] : memref<4x36x8xf32, #tpu.memory_space<vmem>>, vector<1x36x8xf32>
      %73 = vector.shape_cast %72 : vector<1x36x8xf32> to vector<36x8xf32>
      %c2_73 = arith.constant 2 : index
      %c0_74 = arith.constant 0 : index
      %c0_75 = arith.constant 0 : index
      %74 = vector.load %arg4[%c2_73, %c0_74, %c0_75] : memref<4x8x2xf32, #tpu.memory_space<vmem>>, vector<1x8x2xf32>
      %75 = vector.shape_cast %74 : vector<1x8x2xf32> to vector<8x2xf32>
      %cst_76 = arith.constant dense<0.000000e+00> : vector<36x2xf32>
      %76 = tpu.matmul %73, %75, %cst_76 {dimension_numbers = #tpu.dot_dimension_numbers<[1], [0], [0], [1], [0, 0, 1, 1], [], []>} : vector<36x8xf32>, vector<8x2xf32>, vector<36x2xf32> -> vector<36x2xf32>
      %c2_77 = arith.constant 2 : index
      %c0_78 = arith.constant 0 : index
      %c0_79 = arith.constant 0 : index
      %77 = vector.load %arg5[%c2_77, %c0_78, %c0_79] : memref<4x1x2xf32, #tpu.memory_space<vmem>>, vector<1x1x2xf32>
      %78 = vector.shape_cast %77 : vector<1x1x2xf32> to vector<1x2xf32>
      %79 = vector.broadcast %78 : vector<1x2xf32> to vector<36x2xf32>
      %80 = arith.addf %76, %79 : vector<36x2xf32>
      %cst_80 = arith.constant 0.000000e+00 : f32
      %81 = vector.broadcast %cst_80 : f32 to vector<36x2xf32>
      %82 = arith.maximumf %80, %81 : vector<36x2xf32>
      %c0_81 = arith.constant 0 : index
      %c2_82 = arith.constant 2 : index
      %c0_83 = arith.constant 0 : index
      %c0_84 = arith.constant 0 : index
      %83 = vector.load %arg6[%c0_81, %c2_82, %c0_83, %c0_84] : memref<1x4x36x2xf32, #tpu.memory_space<vmem>>, vector<1x1x36x2xf32>
      %84 = vector.shape_cast %83 : vector<1x1x36x2xf32> to vector<36x2xf32>
      %85 = vector.shape_cast %82 : vector<36x2xf32> to vector<1x1x36x2xf32>
      tpu.vector_store %arg6[%c0_81, %c2_82, %c0_83, %c0_84], %85 {strides = array<i32>} : memref<1x4x36x2xf32, #tpu.memory_space<vmem>>, vector<1x1x36x2xf32>,
      %c3_85 = arith.constant 3 : index
      %c0_86 = arith.constant 0 : index
      %c0_87 = arith.constant 0 : index
      %86 = vector.load %arg7[%c3_85, %c0_86, %c0_87] : memref<4x36x8xf32, #tpu.memory_space<vmem>>, vector<1x36x8xf32>
      %87 = vector.shape_cast %86 : vector<1x36x8xf32> to vector<36x8xf32>
      %c3_88 = arith.constant 3 : index
      %c0_89 = arith.constant 0 : index
      %c0_90 = arith.constant 0 : index
      %88 = vector.load %arg4[%c3_88, %c0_89, %c0_90] : memref<4x8x2xf32, #tpu.memory_space<vmem>>, vector<1x8x2xf32>
      %89 = vector.shape_cast %88 : vector<1x8x2xf32> to vector<8x2xf32>
      %cst_91 = arith.constant dense<0.000000e+00> : vector<36x2xf32>
      %90 = tpu.matmul %87, %89, %cst_91 {dimension_numbers = #tpu.dot_dimension_numbers<[1], [0], [0], [1], [0, 0, 1, 1], [], []>} : vector<36x8xf32>, vector<8x2xf32>, vector<36x2xf32> -> vector<36x2xf32>
      %c3_92 = arith.constant 3 : index
      %c0_93 = arith.constant 0 : index
      %c0_94 = arith.constant 0 : index
      %91 = vector.load %arg5[%c3_92, %c0_93, %c0_94] : memref<4x1x2xf32, #tpu.memory_space<vmem>>, vector<1x1x2xf32>
      %92 = vector.shape_cast %91 : vector<1x1x2xf32> to vector<1x2xf32>
      %93 = vector.broadcast %92 : vector<1x2xf32> to vector<36x2xf32>
      %94 = arith.addf %90, %93 : vector<36x2xf32>
      %cst_95 = arith.constant 0.000000e+00 : f32
      %95 = vector.broadcast %cst_95 : f32 to vector<36x2xf32>
      %96 = arith.maximumf %94, %95 : vector<36x2xf32>
      %c0_96 = arith.constant 0 : index
      %c3_97 = arith.constant 3 : index
      %c0_98 = arith.constant 0 : index
      %c0_99 = arith.constant 0 : index
      %97 = vector.load %arg6[%c0_96, %c3_97, %c0_98, %c0_99] : memref<1x4x36x2xf32, #tpu.memory_space<vmem>>, vector<1x1x36x2xf32>
      %98 = vector.shape_cast %97 : vector<1x1x36x2xf32> to vector<36x2xf32>
      %99 = vector.shape_cast %96 : vector<36x2xf32> to vector<1x1x36x2xf32>
      tpu.vector_store %arg6[%c0_96, %c3_97, %c0_98, %c0_99], %99 {strides = array<i32>} : memref<1x4x36x2xf32, #tpu.memory_space<vmem>>, vector<1x1x36x2xf32>,
    } else {
    }
    return
  }
  func.func @transform_0(%arg0: i32, %arg1: i32) -> (i32, i32, i32) {
    %c0_i32 = arith.constant 0 : i32
    %c0_i32_0 = arith.constant 0 : i32
    return %arg0, %arg1, %c0_i32 : i32, i32, i32
  }
  func.func @transform_1(%arg0: i32, %arg1: i32) -> (i32, i32, i32) {
    %c0_i32 = arith.constant 0 : i32
    %c0_i32_0 = arith.constant 0 : i32
    %c0_i32_1 = arith.constant 0 : i32
    return %c0_i32, %c0_i32_0, %arg1 : i32, i32, i32
  }
  func.func @transform_2(%arg0: i32, %arg1: i32) -> (i32, i32, i32) {
    %c0_i32 = arith.constant 0 : i32
    %c0_i32_0 = arith.constant 0 : i32
    %c0_i32_1 = arith.constant 0 : i32
    %c0_i32_2 = arith.constant 0 : i32
    return %c0_i32, %c0_i32_0, %c0_i32_1 : i32, i32, i32
  }
  func.func @transform_3(%arg0: i32, %arg1: i32) -> (i32, i32, i32) {
    %c0_i32 = arith.constant 0 : i32
    %c0_i32_0 = arith.constant 0 : i32
    %c0_i32_1 = arith.constant 0 : i32
    %c0_i32_2 = arith.constant 0 : i32
    return %c0_i32, %c0_i32_0, %c0_i32_1 : i32, i32, i32
  }
  func.func @transform_4(%arg0: i32, %arg1: i32) -> (i32, i32, i32, i32) {
    %c0_i32 = arith.constant 0 : i32
    %c0_i32_0 = arith.constant 0 : i32
    %c0_i32_1 = arith.constant 0 : i32
    %c0_i32_2 = arith.constant 0 : i32
    return %arg0, %c0_i32, %c0_i32_0, %c0_i32_1 : i32, i32, i32, i32
  }
}

</mosaic_0001>

<bundles_post_ra>
// kernel: tpu_custom_call.1
= control target key start
LH: loop header
LB: loop body
LE: loop exit
PB: predicated region body
PF: predicated region fallthrough
CT: control target
= control target key end

     0   :  { %s2149_s15 = smov 0   ;;  %s2151_s16 = smov 0   ;;  %s2609_s0 = inlined_call_operand.vmem [shape: f32[2,256,8], index: 0, kind: input, shape index: {}]   ;;  %s2610_s1 = inlined_call_operand.vmem [shape: f32[4,36,256], index: 1, kind: input, shape index: {}]   ;;  %s2611_s2 = inlined_call_operand.vmem [shape: f32[4,8,2], index: 2, kind: input, shape index: {}]   ;;  %s2612_s3 = inlined_call_operand.vmem [shape: f32[4,1,2], index: 3, kind: input, shape index: {}]   ;;  %s2613_s4 = inlined_call_operand.vmem [shape: f32[2,4,36,2], index: 4, kind: output, shape index: {}]  }
   0x1   :  { %s2153_s17 = smov 0   ;;  %s2155_s18 = smov 0  }
   0x2   :  { %s2157_s19 = smov 0   ;;  %s2159_s20 = smov 0  }
   0x3   :  { %s2161_s21 = smov 0  }
   0x4 LB: > { %s23_s22 = sadd.s32 1, %s2108_s19  ;;  %s26_s23 = sadd.s32 1, %s2112_s20  ;;  %s2116_s21 = sphi %s2161_s21, %s14_s21   ;;  %s2112_s20 = sphi %s2159_s20, %s2619_s20   ;;  %s2108_s19 = sphi %s2157_s19, %s2618_s19   ;;  %s2104_s18 = sphi %s2155_s18, %s2617_s18   ;;  %s2100_s17 = sphi %s2153_s17, %s2616_s17   ;;  %s2096_s16 = sphi %s2151_s16, %s2615_s16   ;;  %s2092_s15 = sphi %s2149_s15, %s2614_s15  }
   0x5   : > { %p24_p0 = scmp.ge.s32.totalorder %s23_s22, 2  ;;  %s61_s24 = sadd.s32 1, %s2096_s16 }
   0x6   : > { %p68_p1 = scmp.ne.s32.totalorder %s2096_s16, %s2092_s15  ;;  %p69_p2 = scmp.eq.s32.totalorder %s2116_s21, 0 }
   0x7   : > { %s2621_s22 = smov (%p24_p0, %s23_s22), 0  ;;  %s2623_s23 = smov (!%p24_p0, %s26_s23), %s2112_s20 }
   0x8   : > { %s58_s25 = ssub.s32 %s2108_s19, %s2621_s22  ;;  %p70_p3 = por %p69_p2, %p68_p1 }
   0x9   : > { %p28_p4 = scmp.ge.s32.totalorder %s2623_s23, 2  ;;  %p59_p5 = scmp.eq.s32.totalorder %s58_s25, 0 }
   0xa   : > { %p1466_p6 = scmp.ge.s32.totalorder %s2116_s21, 4 }
   0xb   : > { %s2625_s23 = smov (%p28_p4, %s2623_s23), 0 }
   0xc   : > { %s2198_s26 = scalar_select %p59_p5, %s2096_s16, %s61_s24  }
   0xd   : > { %168 = sbr.rel (%p1466_p6) target bundleno = 34 (0x22), region = 24 }
  0x14   : > { %184 = sbr.rel (!%p70_p3) target bundleno = 34 (0x22), region = 32  ;;  %s186_s27 = sand.u32 (%p70_p3), 1, %s2096_s16  }
  0x15   : > { %s1467_s28 = sshll.u32 (%p70_p3), %s2108_s19, 3  ;;  %s1997_s29 = smul.u32 (%p70_p3), 160, %s186_s27 }
  0x16   : > { %s2206_s6 = scalar_lea.vmem (%p70_p3), %s2610_s1, %s1467_s28 }
  0x17   : > { %v256_v0 = vld [vmem:[%s2206_s6] sm:$0xff] (%p70_p3)  ;;  %v258_v1 = vld [vmem:[%s2206_s6 + $0x10] sm:$0xff] (%p70_p3)  ;;  %s2214_s7 = scalar_lea.vmem (%p70_p3), [#allocation3], %s1997_s29 }
  0x18   : > { %v260_v2 = vld [vmem:[%s2206_s6 + $0x20] sm:$0xff] (%p70_p3)  ;;  %v262_v3 = vld [vmem:[%s2206_s6 + $0x30] sm:$0xff] (%p70_p3)  ;;  %257 = vst [vmem:[%s2214_s7] sm:$0xff] (%p70_p3), %v256_v0  ;;  %259 = vst [vmem:[%s2214_s7 + $0x8] sm:$0xff] (%p70_p3), %v258_v1 }
  0x19   : > { %v264_v4 = vld [vmem:[%s2206_s6 + $0x40] sm:$0xff] (%p70_p3)  ;;  %v266_v5 = vld [vmem:[%s2206_s6 + $0x50] sm:$0xff] (%p70_p3)  ;;  %261 = vst [vmem:[%s2214_s7 + $0x10] sm:$0xff] (%p70_p3), %v260_v2  ;;  %263 = vst [vmem:[%s2214_s7 + $0x18] sm:$0xff] (%p70_p3), %v262_v3 }
  0x1a   : > { %265 = vst [vmem:[%s2214_s7 + $0x20] sm:$0xff] (%p70_p3), %v264_v4  ;;  %267 = vst [vmem:[%s2214_s7 + $0x28] sm:$0xff] (%p70_p3), %v266_v5  ;;  %v268_v6 = vld [vmem:[%s2206_s6 + $0x60] sm:$0xff] (%p70_p3)  ;;  %v270_v7 = vld [vmem:[%s2206_s6 + $0x70] sm:$0xff] (%p70_p3) }
  0x1b   : > { %v272_v8 = vld [vmem:[%s2206_s6 + $0x80] sm:$0xff]  ;;  %269 = vst [vmem:[%s2214_s7 + $0x30] sm:$0xff] %v268_v6  ;;  %271 = vst [vmem:[%s2214_s7 + $0x38] sm:$0xff] %v270_v7  ;;  %v274_v9 = vld [vmem:[%s2206_s6 + $0x90] sm:$0xff] }
  0x1c   : > { %273 = vst [vmem:[%s2214_s7 + $0x40] sm:$0xff] %v272_v8  ;;  %v276_v10 = vld [vmem:[%s2206_s6 + $0xa0] sm:$0xff]  ;;  %v278_v11 = vld [vmem:[%s2206_s6 + $0xb0] sm:$0xff]  ;;  %275 = vst [vmem:[%s2214_s7 + $0x48] sm:$0xff] %v274_v9 }
  0x1d   : > { %277 = vst [vmem:[%s2214_s7 + $0x50] sm:$0xff] %v276_v10  ;;  %279 = vst [vmem:[%s2214_s7 + $0x58] sm:$0xff] %v278_v11  ;;  %v280_v12 = vld [vmem:[%s2206_s6 + $0xc0] sm:$0xff]  ;;  %v282_v13 = vld [vmem:[%s2206_s6 + $0xd0] sm:$0xff] }
  0x1e   : > { %v284_v14 = vld [vmem:[%s2206_s6 + $0xe0] sm:$0xff]  ;;  %281 = vst [vmem:[%s2214_s7 + $0x60] sm:$0xff] %v280_v12  ;;  %283 = vst [vmem:[%s2214_s7 + $0x68] sm:$0xff] %v282_v13  ;;  %v286_v15 = vld [vmem:[%s2206_s6 + $0xf0] sm:$0xff] }
  0x1f   : > { %285 = vst [vmem:[%s2214_s7 + $0x70] sm:$0xff] %v284_v14  ;;  %v288_v16 = vld [vmem:[%s2206_s6 + $0x100] sm:$0xff]  ;;  %v290_v17 = vld [vmem:[%s2206_s6 + $0x110] sm:$0xff]  ;;  %287 = vst [vmem:[%s2214_s7 + $0x78] sm:$0xff] %v286_v15 }
  0x20   : > { %289 = vst [vmem:[%s2214_s7 + $0x80] sm:$0xff] %v288_v16  ;;  %291 = vst [vmem:[%s2214_s7 + $0x88] sm:$0xff] %v290_v17  ;;  %v292_v18 = vld [vmem:[%s2206_s6 + $0x120] sm:$0xff]  ;;  %v294_v19 = vld [vmem:[%s2206_s6 + $0x130] sm:$0xff] }
  0x21   : > { %293 = vst [vmem:[%s2214_s7 + $0x90] sm:$0xff] %v292_v18  ;;  %295 = vst [vmem:[%s2214_s7 + $0x98] sm:$0xff] %v294_v19 }
  0x22 PF: > { %p1468_p7 = scmp.ge.s32.totalorder %s2116_s21, 1  ;;  %p300_p8 = scmp.lt.s32.totalorder %s2116_s21, 5 }
  0x24   : > { %p301_p9 = pnand %p1468_p7, %p300_p8 }
  0x25   : > { %s307_s8 = sand.u32 (!%p301_p9), 1, %s2092_s15   ;;  %s1469_s9 = sshll.u32 (!%p301_p9), %s2100_s17, 4 }
  0x26   : > { %304 = sbr.rel (%p301_p9) target bundleno = 578 (0x242), region = 70  ;;  %p342_p10 = scmp.lt.s32.totalorder (!%p301_p9), %s2104_s18, 1 }
  0x27   : > { %s1998_s10 = smul.u32 (!%p301_p9), 160, %s307_s8  ;;  %p344_p11 = scmp.lt.s32.totalorder (!%p301_p9), %s1469_s9, 31 }
  0x28   : > { %p1473_p12 = scmp.ne.s32.totalorder (!%p301_p9), %s2100_s17, 0 }
  0x29   : > { %s2266_s15 = scalar_lea.vmem (!%p301_p9), [#allocation3], %s1998_s10 }
  0x2d   : > { %s2627_s18 = smov (!%p342_p10, %s2104_s18), 1  ;;  %s2629_s9 = smov (!%p344_p11, %s1469_s9), 31 }
  0x2e   : > { %s1470_s11 = sshll.u32 %s2627_s18, 5  ;;  %s1999_s12 = smul.u32 160, %s2627_s18  ;;  %vm360_vm0 = vcmask (!%p1473_p12), 64512   ;;  %vm365_vm1 = vcmask (!%p1473_p12), 60416   ;;  %v2118_v20 = vmov (!%p1473_p12), 0.0  }
  0x2f   : > { %s347_s13 = sadd.s32 %s1470_s11, %s2629_s9  ;;  %359 = sbr.rel (%p1473_p12) target bundleno = 57 (0x39), region = 78  ;;  %361 = vst.msk [vmem:[#allocation2] sm:$0xff] (!%p1473_p12), %vm360_vm0, %v2118_v20  ;;  %362 = vst.msk [vmem:[#allocation2 + $0x8] sm:$0xff] (!%p1473_p12), %vm360_vm0, %v2118_v20 }
  0x30   : > { %s1471_s14 = sshll.u32 %s347_s13, 3  ;;  %s2259_s27 = scalar_lea.vmem %s2613_s4, %s1999_s12  ;;  %363 = vst.msk [vmem:[#allocation2 + $0x10] sm:$0xff] (!%p1473_p12), %vm360_vm0, %v2118_v20  ;;  %364 = vst.msk [vmem:[#allocation2 + $0x18] sm:$0xff] (!%p1473_p12), %vm360_vm0, %v2118_v20 }
  0x31   : > { %s2264_s30 = scalar_lea.vmem %s2609_s0, %s1471_s14  ;;  %367 = vst.msk [vmem:[#allocation2 + $0x28] sm:$0xff] (!%p1473_p12), %vm360_vm0, %v2118_v20  ;;  %368 = vst.msk [vmem:[#allocation2 + $0x30] sm:$0xff] (!%p1473_p12), %vm360_vm0, %v2118_v20 }
  0x32   : > { %369 = vst.msk [vmem:[#allocation2 + $0x38] sm:$0xff] (!%p1473_p12), %vm360_vm0, %v2118_v20  ;;  %370 = vst.msk [vmem:[#allocation2 + $0x40] sm:$0xff] (!%p1473_p12), %vm360_vm0, %v2118_v20 }
  0x33   : > { %372 = vst.msk [vmem:[#allocation2 + $0x50] sm:$0xff] (!%p1473_p12), %vm360_vm0, %v2118_v20  ;;  %373 = vst.msk [vmem:[#allocation2 + $0x58] sm:$0xff] (!%p1473_p12), %vm360_vm0, %v2118_v20 }
  0x34   : > { %374 = vst.msk [vmem:[#allocation2 + $0x60] sm:$0xff] (!%p1473_p12), %vm360_vm0, %v2118_v20  ;;  %375 = vst.msk [vmem:[#allocation2 + $0x68] sm:$0xff] (!%p1473_p12), %vm360_vm0, %v2118_v20 }
  0x35   : > { %377 = vst.msk [vmem:[#allocation2 + $0x78] sm:$0xff] (!%p1473_p12), %vm360_vm0, %v2118_v20  ;;  %378 = vst.msk [vmem:[#allocation2 + $0x80] sm:$0xff] (!%p1473_p12), %vm360_vm0, %v2118_v20 }
  0x36   : > { %379 = vst.msk [vmem:[#allocation2 + $0x88] sm:$0xff] %vm360_vm0, %v2118_v20  ;;  %380 = vst.msk [vmem:[#allocation2 + $0x90] sm:$0xff] %vm360_vm0, %v2118_v20 }
  0x37   : > { %366 = vst.msk [vmem:[#allocation2 + $0x20] sm:$0xf] %vm365_vm1, %v2118_v20  ;;  %371 = vst.msk [vmem:[#allocation2 + $0x48] sm:$0xf] %vm365_vm1, %v2118_v20 }
  0x38   : > { %376 = vst.msk [vmem:[#allocation2 + $0x70] sm:$0xf] %vm365_vm1, %v2118_v20  ;;  %381 = vst.msk [vmem:[#allocation2 + $0x98] sm:$0xf] %vm365_vm1, %v2118_v20 }
  0x39 PF: > { %v382_v21 = vld [vmem:[%s2264_s30] sm:$0xff]  ;;  %v383_v22 = vld [vmem:[%s2264_s30 + $0x8] sm:$0xff]  ;;  %v384_v23 = vld [vmem:[%s2264_s30 + $0x10] sm:$0xff]  ;;  %v2119_v24 = vmov 0.0|0.0   ;;  %vm2120_vm2 = vmmov 0   ;;  %v2121_v27 = vmov 0.0  }
  0x3a   : > { %1901 = vmatprep.subr.bf16.mxu0 %v2119_v24  ;;  %1925 = vmatprep.subr.bf16.mxu1 %v2119_v24  ;;  %v1902_v25 = vpack.c.bf16 %v383_v22, %v382_v21  ;;  %v385_v26 = vld [vmem:[%s2264_s30 + $0x18] sm:$0xff]  ;;  %v386_v29 = vld [vmem:[%s2264_s30 + $0x20] sm:$0xff]  ;;  %v387_v30 = vld [vmem:[%s2264_s30 + $0x28] sm:$0xff]  ;;  %vm503_vm3 = vcmask 64512   ;;  %vm508_vm4 = vcmask 60416   ;;  %p1489_p13 = scmp.ne.s32.totalorder %s2100_s17, 1 }
  0x3b   : > { %1677 = vmatprep.mubr.msk.f32.mxu0 %vm2120_vm2, %v2121_v27  ;;  %1724 = vmatprep.mubr.msk.f32.mxu1 %vm2120_vm2, %v2121_v27  ;;  %v2299_v28 = vpack.c.bf16 %v385_v26, %v384_v23  ;;  %v2307_v31 = vpack.c.bf16 %v387_v30, %v386_v29  ;;  %v388_v32 = vld [vmem:[%s2264_s30 + $0x30] sm:$0xff]  ;;  %v389_v33 = vld [vmem:[%s2264_s30 + $0x38] sm:$0xff]  ;;  %v390_v35 = vld [vmem:[%s2264_s30 + $0x40] sm:$0xff]  ;;  %vm2123_vm5 = vmmov (!%p1489_p13), 0   ;;  %vm973_vm6 = vcmask (!%p1489_p13), 15360  }
  0x3c   : > { %1903 = vmatpush3.bf16.msra.mxu0 %v1902_v25  ;;  %1927 = vmatpush3.bf16.msra.mxu1 %v1902_v25  ;;  %v2315_v34 = vpack.c.bf16 %v389_v33, %v388_v32  ;;  %v391_v36 = vld [vmem:[%s2264_s30 + $0x48] sm:$0xff]  ;;  %v392_v38 = vld [vmem:[%s2264_s30 + $0x50] sm:$0xff]  ;;  %v393_v39 = vld [vmem:[%s2264_s30 + $0x58] sm:$0xff]  ;;  %vm978_vm7 = vcmask (!%p1489_p13), 11264  }
  0x3d   : > { %1904 = vmatprep.subr.bf16.mxu0 %v2119_v24  ;;  %1928 = vmatprep.subr.bf16.mxu1 %v2119_v24  ;;  %v2323_v37 = vpack.c.bf16 %v391_v36, %v390_v35  ;;  %v2331_v40 = vpack.c.bf16 %v393_v39, %v392_v38  ;;  %v394_v41 = vld [vmem:[%s2264_s30 + $0x60] sm:$0xff]  ;;  %v395_v42 = vld [vmem:[%s2264_s30 + $0x68] sm:$0xff]  ;;  %v396_v44 = vld [vmem:[%s2264_s30 + $0x70] sm:$0xff] }
  0x3e   : > { %v2339_v43 = vpack.c.bf16 %v395_v42, %v394_v41  ;;  %v397_v45 = vld [vmem:[%s2264_s30 + $0x78] sm:$0xff]  ;;  %v403_v47 = vld [vmem:[%s2266_s15] sm:$0xff]  ;;  %v1474_v48 = vld [vmem:[%s2266_s15 + $0x28] sm:$0xff] }
  0x3f   : > { %v2347_v46 = vpack.c.bf16 %v397_v45, %v396_v44  ;;  %v404_v49 = vld [vmem:[%s2266_s15 + $0x8] sm:$0xff]  ;;  %v1475_v50 = vld [vmem:[%s2266_s15 + $0x30] sm:$0xff]  ;;  %v1476_v52 = vld [vmem:[%s2266_s15 + $0x38] sm:$0xff] }
  0x40   : > { %1906 = vmatpush3.bf16.msra.mxu0 %v2299_v28  ;;  %1930 = vmatpush3.bf16.msra.mxu1 %v2299_v28  ;;  %v405_v51 = vld [vmem:[%s2266_s15 + $0x10] sm:$0xff]  ;;  %v406_v53 = vld [vmem:[%s2266_s15 + $0x18] sm:$0xff]  ;;  %v1477_v54 = vld [vmem:[%s2266_s15 + $0x40] sm:$0xff] }
  0x41   : > { %1907 = vmatprep.subr.bf16.mxu0 %v2119_v24  ;;  %1931 = vmatprep.subr.bf16.mxu1 %v2119_v24  ;;  %v407_v55 = vld [vmem:[%s2266_s15 + $0x20] sm:$0xf]  ;;  %v1478_v56 = vld [vmem:[%s2266_s15 + $0x48] sm:$0xf]  ;;  %v1479_v57 = vld [vmem:[%s2266_s15 + $0x50] sm:$0xff] }
  0x42   : > { %v1484_v58 = vld [vmem:[%s2266_s15 + $0x78] sm:$0xff]  ;;  %v1485_v60 = vld [vmem:[%s2266_s15 + $0x80] sm:$0xff]  ;;  %v1486_v62 = vld [vmem:[%s2266_s15 + $0x88] sm:$0xff] }
  0x43   : > { %v1480_v59 = vld [vmem:[%s2266_s15 + $0x58] sm:$0xff]  ;;  %v1481_v61 = vld [vmem:[%s2266_s15 + $0x60] sm:$0xff]  ;;  %v1482_v63 = vld [vmem:[%s2266_s15 + $0x68] sm:$0xff] }
  0x44   : > { %1909 = vmatpush3.bf16.msra.mxu0 %v2307_v31  ;;  %1933 = vmatpush3.bf16.msra.mxu1 %v2307_v31  ;;  %v1487_v0 = vld [vmem:[%s2266_s15 + $0x90] sm:$0xff]  ;;  %v1488_v2 = vld [vmem:[%s2266_s15 + $0x98] sm:$0xf]  ;;  %v398_v3 = vld [vmem:[#allocation2] sm:$0xff] }
  0x45   : > { %1910 = vmatprep.subr.bf16.mxu0 %v2119_v24  ;;  %1934 = vmatprep.subr.bf16.mxu1 %v2119_v24  ;;  %v1483_v1 = vld [vmem:[%s2266_s15 + $0x70] sm:$0xf]  ;;  %v511_v4 = vld [vmem:[#allocation2 + $0x28] sm:$0xff]  ;;  %v513_v20 = vld [vmem:[#allocation2 + $0x38] sm:$0xff] }
  0x46   : > { %v399_v11 = vld [vmem:[#allocation2 + $0x8] sm:$0xff]  ;;  %v512_v12 = vld [vmem:[#allocation2 + $0x30] sm:$0xff]  ;;  %v402_v35 = vld [vmem:[#allocation2 + $0x20] sm:$0xf] }
  0x47   : > { %v400_v19 = vld [vmem:[#allocation2 + $0x10] sm:$0xff]  ;;  %v515_v36 = vld [vmem:[#allocation2 + $0x48] sm:$0xf]  ;;  %v735_v44 = vld [vmem:[#allocation2 + $0x78] sm:$0xff] }
  0x48   : > { %1912 = vmatpush3.bf16.msra.mxu0 %v2315_v34  ;;  %1936 = vmatpush3.bf16.msra.mxu1 %v2315_v34 }
  0x49   : > { %1913 = vmatprep.subr.bf16.mxu0 %v2119_v24  ;;  %1937 = vmatprep.subr.bf16.mxu1 %v2119_v24 }
  0x4c   : > { %1915 = vmatpush3.bf16.msra.mxu0 %v2323_v37  ;;  %1939 = vmatpush3.bf16.msra.mxu1 %v2323_v37 }
  0x4d   : > { %1916 = vmatprep.subr.bf16.mxu0 %v2119_v24  ;;  %1940 = vmatprep.subr.bf16.mxu1 %v2119_v24 }
  0x50   : > { %1918 = vmatpush3.bf16.msra.mxu0 %v2331_v40  ;;  %1942 = vmatpush3.bf16.msra.mxu1 %v2331_v40 }
  0x51   : > { %1919 = vmatprep.subr.bf16.mxu0 %v2119_v24  ;;  %1943 = vmatprep.subr.bf16.mxu1 %v2119_v24 }
  0x54   : > { %1921 = vmatpush3.bf16.msra.mxu0 %v2339_v43  ;;  %1945 = vmatpush3.bf16.msra.mxu1 %v2339_v43 }
  0x55   : > { %1922 = vmatprep.subr.bf16.mxu0 %v2119_v24  ;;  %1946 = vmatprep.subr.bf16.mxu1 %v2119_v24 }
  0x58   : > { %1924 = vmatpush3.bf16.msra.mxu0 %v2347_v46  ;;  %1948 = vmatpush3.bf16.msra.mxu1 %v2347_v46 }
  0x59   : > { %1949 = vmatprep.subr.bf16.mxu0 %v2119_v24  ;;  %1973 = vmatprep.subr.bf16.mxu1 %v2119_v24 }
  0x5b   : > { %1678 = vmatmul.mubr.f32.vlgmr.msra.gmra.mrb[0].mxu0 %v403_v47  ;;  %1725 = vmatmul.mubr.f32.vlgmr.msra.gmra.mrb[0].mxu1 %v1474_v48 }
  0x5c   : > { %1951 = vmatpush3.bf16.msra.mxu0 %v1902_v25  ;;  %1975 = vmatpush3.bf16.msra.mxu1 %v1902_v25 }
  0x5d   : > { %1952 = vmatprep.subr.bf16.mxu0 %v2119_v24  ;;  %1976 = vmatprep.subr.bf16.mxu1 %v2119_v24 }
  0x5e   : > { %1680 = vmatprep.mubr.msk.f32.mxu0 %vm2120_vm2, %v2121_v27  ;;  %1727 = vmatprep.mubr.msk.f32.mxu1 %vm2120_vm2, %v2121_v27 }
  0x5f   : > { %1681 = vmatmul.mubr.f32.gmra.mrb[2].mxu0 %v404_v49  ;;  %1728 = vmatmul.mubr.f32.gmra.mrb[2].mxu1 %v1475_v50 }
  0x60   : > { %1954 = vmatpush3.bf16.msra.mxu0 %v2299_v28  ;;  %1978 = vmatpush3.bf16.msra.mxu1 %v2299_v28  ;;  %v514_v28 = vld [vmem:[#allocation2 + $0x40] sm:$0xff] }
  0x61   : > { %1955 = vmatprep.subr.bf16.mxu0 %v2119_v24  ;;  %1979 = vmatprep.subr.bf16.mxu1 %v2119_v24 }
  0x62   : > { %1683 = vmatprep.mubr.msk.f32.mxu0 %vm2120_vm2, %v2121_v27  ;;  %1730 = vmatprep.mubr.msk.f32.mxu1 %vm2120_vm2, %v2121_v27 }
  0x63   : > { %1684 = vmatmul.mubr.f32.gmra.mrb[4].mxu0 %v405_v51  ;;  %1731 = vmatmul.mubr.f32.gmra.mrb[4].mxu1 %v1476_v52  ;;  %v624_v51 = vld [vmem:[#allocation2 + $0x58] sm:$0xff]  ;;  %v736_v52 = vld [vmem:[#allocation2 + $0x80] sm:$0xff] }
  0x64   : > { %1957 = vmatpush3.bf16.msra.mxu0 %v2307_v31  ;;  %1981 = vmatpush3.bf16.msra.mxu1 %v2307_v31 }
  0x65   : > { %1958 = vmatprep.subr.bf16.mxu0 %v2119_v24  ;;  %1982 = vmatprep.subr.bf16.mxu1 %v2119_v24 }
  0x66   : > { %1686 = vmatprep.mubr.msk.f32.mxu0 %vm2120_vm2, %v2121_v27  ;;  %1733 = vmatprep.mubr.msk.f32.mxu1 %vm2120_vm2, %v2121_v27 }
  0x67   : > { %1687 = vmatmul.mubr.f32.gmra.mrb[6].mxu0 %v406_v53  ;;  %1734 = vmatmul.mubr.f32.gmra.mrb[6].mxu1 %v1477_v54 }
  0x68   : > { %1960 = vmatpush3.bf16.msra.mxu0 %v2315_v34  ;;  %1984 = vmatpush3.bf16.msra.mxu1 %v2315_v34 }
  0x69   : > { %1961 = vmatprep.subr.bf16.mxu0 %v2119_v24  ;;  %1985 = vmatprep.subr.bf16.mxu1 %v2119_v24 }
  0x6a   : > { %1689 = vmatprep.mubr.msk.f32.mxu0 %vm2120_vm2, %v2121_v27  ;;  %1736 = vmatprep.mubr.msk.f32.mxu1 %vm2120_vm2, %v2121_v27 }
  0x6b   : > { %1690 = vmatmul.mubr.f32.gmra.mrb[8].mxu0 %v407_v55  ;;  %1737 = vmatmul.mubr.f32.gmra.mrb[8].mxu1 %v1478_v56 }
  0x6c   : > { %1963 = vmatpush3.bf16.msra.mxu0 %v2323_v37  ;;  %1987 = vmatpush3.bf16.msra.mxu1 %v2323_v37 }
  0x6d   : > { %1964 = vmatprep.subr.bf16.mxu0 %v2119_v24  ;;  %1988 = vmatprep.subr.bf16.mxu1 %v2119_v24 }
  0x6e   : > { %1771 = vmatprep.mubr.msk.f32.mxu0 %vm2120_vm2, %v2121_v27  ;;  %1818 = vmatprep.mubr.msk.f32.mxu1 %vm2120_vm2, %v2121_v27 }
  0x70   : > { %1966 = vmatpush3.bf16.msra.mxu0 %v2331_v40  ;;  %1990 = vmatpush3.bf16.msra.mxu1 %v2331_v40 }
  0x71   : > { %1967 = vmatprep.subr.bf16.mxu0 %v2119_v24  ;;  %1991 = vmatprep.subr.bf16.mxu1 %v2119_v24 }
  0x74   : > { %1969 = vmatpush3.bf16.msra.mxu0 %v2339_v43  ;;  %1993 = vmatpush3.bf16.msra.mxu1 %v2339_v43  ;;  %v623_v43 = vld [vmem:[#allocation2 + $0x50] sm:$0xff] }
  0x75   : > { %1970 = vmatprep.subr.bf16.mxu0 %v2119_v24  ;;  %1994 = vmatprep.subr.bf16.mxu1 %v2119_v24 }
  0x78   : > { %1972 = vmatpush3.bf16.msra.mxu0 %v2347_v46  ;;  %1996 = vmatpush3.bf16.msra.mxu1 %v2347_v46 }
  0x7b   : > { %1772 = vmatmul.mubr.f32.vlgmr.msra.gmra.mrb[10].mxu0 %v1479_v57  ;;  %1819 = vmatmul.mubr.f32.vlgmr.msra.gmra.mrb[10].mxu1 %v1484_v58 }
  0x7c   : > { %1774 = vmatprep.mubr.msk.f32.mxu0 %vm2120_vm2, %v2121_v27  ;;  %1821 = vmatprep.mubr.msk.f32.mxu1 %vm2120_vm2, %v2121_v27 }
  0x7f   : > { %1775 = vmatmul.mubr.f32.gmra.mrb[12].mxu0 %v1480_v59  ;;  %1822 = vmatmul.mubr.f32.gmra.mrb[12].mxu1 %v1485_v60  ;;  %v625_v59 = vld [vmem:[#allocation2 + $0x60] sm:$0xff]  ;;  %v737_v60 = vld [vmem:[#allocation2 + $0x88] sm:$0xff] }
  0x80   : > { %1777 = vmatprep.mubr.msk.f32.mxu0 %vm2120_vm2, %v2121_v27  ;;  %1824 = vmatprep.mubr.msk.f32.mxu1 %vm2120_vm2, %v2121_v27 }
  0x83   : > { %1778 = vmatmul.mubr.f32.gmra.mrb[14].mxu0 %v1481_v61  ;;  %1825 = vmatmul.mubr.f32.gmra.mrb[14].mxu1 %v1486_v62 }
  0x84   : > { %1780 = vmatprep.mubr.msk.f32.mxu0 %vm2120_vm2, %v2121_v27  ;;  %1827 = vmatprep.mubr.msk.f32.mxu1 %vm2120_vm2, %v2121_v27 }
  0x87   : > { %1781 = vmatmul.mubr.f32.gmra.mrb[16].mxu0 %v1482_v63  ;;  %1828 = vmatmul.mubr.f32.gmra.mrb[16].mxu1 %v1487_v0 }
  0x88   : > { %1783 = vmatprep.mubr.msk.f32.mxu0 %vm2120_vm2, %v2121_v27  ;;  %1830 = vmatprep.mubr.msk.f32.mxu1 %vm2120_vm2, %v2121_v27  ;;  %v401_v27 = vld [vmem:[#allocation2 + $0x18] sm:$0xff] }
  0x8b   : > { %1784 = vmatmul.mubr.f32.gmra.mrb[18].mxu0 %v1483_v1  ;;  %1831 = vmatmul.mubr.f32.gmra.mrb[18].mxu1 %v1488_v2 }
 0x12e   : > { %v474_v5 = vpop.f32.mrb[0].mxu0  ;;  %v588_v6 = vpop.f32.mrb[0].mxu1 }
 0x12f   : > { %v498_v7 = vadd.f32 %v474_v5, %v398_v3  ;;  %v612_v8 = vadd.f32 %v588_v6, %v511_v4  ;;  %v1679_v9 = vpop.f32.mrb[1].mxu0  ;;  %v1726_v10 = vpop.f32.mrb[1].mxu1  ;;  %v626_v3 = vld [vmem:[#allocation2 + $0x68] sm:$0xff]  ;;  %v738_v4 = vld [vmem:[#allocation2 + $0x90] sm:$0xff] }
 0x131   : > { %504 = vst.msk [vmem:[#allocation2] sm:$0xff] %vm503_vm3, %v498_v7  ;;  %617 = vst.msk [vmem:[#allocation2 + $0x28] sm:$0xff] %vm503_vm3, %v612_v8 }
 0x132   : > { %v479_v13 = vpop.f32.mrb[2].mxu0  ;;  %v593_v14 = vpop.f32.mrb[2].mxu1 }
 0x133   : > { %v499_v15 = vadd.f32 %v479_v13, %v399_v11  ;;  %v613_v16 = vadd.f32 %v593_v14, %v512_v12  ;;  %v1682_v17 = vpop.f32.mrb[3].mxu0  ;;  %v1729_v18 = vpop.f32.mrb[3].mxu1  ;;  %v627_v11 = vld [vmem:[#allocation2 + $0x70] sm:$0xf]  ;;  %v739_v12 = vld [vmem:[#allocation2 + $0x98] sm:$0xf] }
 0x135   : > { %505 = vst.msk [vmem:[#allocation2 + $0x8] sm:$0xff] %vm503_vm3, %v499_v15  ;;  %618 = vst.msk [vmem:[#allocation2 + $0x30] sm:$0xff] %vm503_vm3, %v613_v16 }
 0x136   : > { %v484_v21 = vpop.f32.mrb[4].mxu0  ;;  %v598_v22 = vpop.f32.mrb[4].mxu1 }
 0x137   : > { %v500_v23 = vadd.f32 %v484_v21, %v400_v19  ;;  %v614_v24 = vadd.f32 %v598_v22, %v513_v20  ;;  %v1685_v25 = vpop.f32.mrb[5].mxu0  ;;  %v1732_v26 = vpop.f32.mrb[5].mxu1  ;;  %v855_v19 = vld [vmem:[%s2611_s2] sm:$0xff] (!%p1489_p13)  ;;  %v1496_v20 = vld [vmem:[%s2611_s2 + $0x8] sm:$0xff] (!%p1489_p13)  ;;  %v2122_v21 = vmov (!%p1489_p13), 0.0  }
 0x138   : > { %1833 = vmatprep.subr.mxu0 (!%p1489_p13), %v2122_v21  ;;  %1850 = vmatprep.subr.mxu1 (!%p1489_p13), %v2122_v21  ;;  %v850_v22 = vld [vmem:[#allocation2] sm:$0xff] (!%p1489_p13)  ;;  %v1522_v25 = vld [vmem:[%s2611_s2 + $0x18] sm:$0xff] (!%p1489_p13) }
 0x139   : > { %506 = vst.msk [vmem:[#allocation2 + $0x10] sm:$0xff] %vm503_vm3, %v500_v23  ;;  %619 = vst.msk [vmem:[#allocation2 + $0x38] sm:$0xff] %vm503_vm3, %v614_v24  ;;  %v980_v23 = vld [vmem:[#allocation2 + $0x28] sm:$0xff] (!%p1489_p13)  ;;  %1834 = vmatpush3.msra.mxu0 (!%p1489_p13), %v855_v19  ;;  %1835 = vmatprep.mubr.msk.f32.mxu0 (!%p1489_p13), %vm2123_vm5, %v2122_v21  ;;  %v1509_v24 = vld [vmem:[%s2611_s2 + $0x10] sm:$0xff] (!%p1489_p13) }
 0x13a   : > { %v489_v29 = vpop.f32.mrb[6].mxu0  ;;  %v603_v30 = vpop.f32.mrb[6].mxu1  ;;  %1851 = vmatpush3.msra.mxu1 (!%p1489_p13), %v1496_v20  ;;  %1852 = vmatprep.mubr.msk.f32.mxu1 (!%p1489_p13), %vm2123_vm5, %v2122_v21  ;;  %v1511_v20 = vld [vmem:[%s2612_s3 + $0x2] ss:$0 sm:$0xff] (!%p1489_p13) }
 0x13b   : > { %v501_v31 = vadd.f32 %v489_v29, %v401_v27  ;;  %v615_v32 = vadd.f32 %v603_v30, %v514_v28  ;;  %v1688_v33 = vpop.f32.mrb[7].mxu0  ;;  %v1735_v34 = vpop.f32.mrb[7].mxu1  ;;  %1836 = vmatmul.mubr.msk.f32.vlgmr.msra.gmra.mrb[0].mxu0 (!%p1489_p13), %vm503_vm3, %v850_v22  ;;  %1853 = vmatmul.mubr.msk.f32.vlgmr.msra.gmra.mrb[0].mxu1 (!%p1489_p13), %vm503_vm3, %v980_v23 }
 0x13c   : > { %1867 = vmatprep.subr.mxu0 (!%p1489_p13), %v2122_v21  ;;  %1884 = vmatprep.subr.mxu1 (!%p1489_p13), %v2122_v21  ;;  %v851_v26 = vld [vmem:[#allocation2 + $0x8] sm:$0xff] (!%p1489_p13)  ;;  %v981_v27 = vld [vmem:[#allocation2 + $0x30] sm:$0xff] (!%p1489_p13) }
 0x13d   : > { %507 = vst.msk [vmem:[#allocation2 + $0x18] sm:$0xff] %vm503_vm3, %v501_v31  ;;  %620 = vst.msk [vmem:[#allocation2 + $0x40] sm:$0xff] %vm503_vm3, %v615_v32  ;;  %1868 = vmatpush3.msra.mxu0 (!%p1489_p13), %v1509_v24  ;;  %1885 = vmatpush3.msra.mxu1 (!%p1489_p13), %v1522_v25 }
 0x13e   : > { %v494_v37 = vpop.f32.mrb[8].mxu0  ;;  %v608_v38 = vpop.f32.mrb[8].mxu1  ;;  %1838 = vmatprep.mubr.msk.f32.mxu0 (!%p1489_p13), %vm2123_vm5, %v2122_v21  ;;  %1855 = vmatprep.mubr.msk.f32.mxu1 (!%p1489_p13), %vm2123_vm5, %v2122_v21 }
 0x13f   : > { %v502_v39 = vadd.f32 %v494_v37, %v402_v35  ;;  %v616_v40 = vadd.f32 %v608_v38, %v515_v36  ;;  %v1691_v41 = vpop.f32.mrb[9].mxu0  ;;  %v1738_v42 = vpop.f32.mrb[9].mxu1  ;;  %1839 = vmatmul.mubr.msk.f32.gmra.mrb[2].mxu0 (!%p1489_p13), %vm503_vm3, %v851_v26  ;;  %1856 = vmatmul.mubr.msk.f32.gmra.mrb[2].mxu1 (!%p1489_p13), %vm503_vm3, %v981_v27 }
 0x140   : > { %1841 = vmatprep.mubr.msk.f32.mxu0 (!%p1489_p13), %vm2123_vm5, %v2122_v21  ;;  %1858 = vmatprep.mubr.msk.f32.mxu1 (!%p1489_p13), %vm2123_vm5, %v2122_v21  ;;  %v852_v28 = vld [vmem:[#allocation2 + $0x10] sm:$0xff] (!%p1489_p13)  ;;  %v982_v29 = vld [vmem:[#allocation2 + $0x38] sm:$0xff] (!%p1489_p13) }
 0x141   : > { %509 = vst.msk [vmem:[#allocation2 + $0x20] sm:$0xf] %vm508_vm4, %v502_v39  ;;  %621 = vst.msk [vmem:[#allocation2 + $0x48] sm:$0xf] %vm508_vm4, %v616_v40 }
 0x143   : > { %1842 = vmatmul.mubr.msk.f32.gmra.mrb[4].mxu0 (!%p1489_p13), %vm503_vm3, %v852_v28  ;;  %1859 = vmatmul.mubr.msk.f32.gmra.mrb[4].mxu1 (!%p1489_p13), %vm503_vm3, %v982_v29 }
 0x144   : > { %1844 = vmatprep.mubr.msk.f32.mxu0 (!%p1489_p13), %vm2123_vm5, %v2122_v21  ;;  %1861 = vmatprep.mubr.msk.f32.mxu1 (!%p1489_p13), %vm2123_vm5, %v2122_v21  ;;  %v853_v30 = vld [vmem:[#allocation2 + $0x18] sm:$0xff] (!%p1489_p13)  ;;  %v983_v31 = vld [vmem:[#allocation2 + $0x40] sm:$0xff] (!%p1489_p13) }
 0x147   : > { %1845 = vmatmul.mubr.msk.f32.gmra.mrb[6].mxu0 (!%p1489_p13), %vm503_vm3, %v853_v30  ;;  %1862 = vmatmul.mubr.msk.f32.gmra.mrb[6].mxu1 (!%p1489_p13), %vm503_vm3, %v983_v31 }
 0x148   : > { %1847 = vmatprep.mubr.msk.f32.mxu0 (!%p1489_p13), %vm2123_vm5, %v2122_v21  ;;  %1864 = vmatprep.mubr.msk.f32.mxu1 (!%p1489_p13), %vm2123_vm5, %v2122_v21  ;;  %v854_v32 = vld [vmem:[#allocation2 + $0x20] sm:$0xf] (!%p1489_p13)  ;;  %v984_v33 = vld [vmem:[#allocation2 + $0x48] sm:$0xf] (!%p1489_p13) }
 0x14b   : > { %1848 = vmatmul.mubr.msk.f32.gmra.mrb[8].mxu0 (!%p1489_p13), %vm503_vm3, %v854_v32  ;;  %1865 = vmatmul.mubr.msk.f32.gmra.mrb[8].mxu1 (!%p1489_p13), %vm503_vm3, %v984_v33 }
 0x14c   : > { %1869 = vmatprep.mubr.msk.f32.mxu0 (!%p1489_p13), %vm2123_vm5, %v2122_v21  ;;  %1886 = vmatprep.mubr.msk.f32.mxu1 (!%p1489_p13), %vm2123_vm5, %v2122_v21 }
 0x14e   : > { %v700_v45 = vpop.f32.mrb[10].mxu0  ;;  %v812_v46 = vpop.f32.mrb[10].mxu1 }
 0x14f   : > { %v724_v47 = vadd.f32 %v700_v45, %v623_v43  ;;  %v836_v48 = vadd.f32 %v812_v46, %v735_v44  ;;  %v1773_v49 = vpop.f32.mrb[11].mxu0  ;;  %v1820_v50 = vpop.f32.mrb[11].mxu1  ;;  %v1490_v44 = vld [vmem:[%s2612_s3] ss:$0 sm:$0xff] (!%p1489_p13)  ;;  %v1498_v45 = vld [vmem:[%s2612_s3 + $0x1] ss:$0 sm:$0xff] (!%p1489_p13) }
 0x151   : > { %729 = vst.msk [vmem:[#allocation2 + $0x50] sm:$0xff] %vm503_vm3, %v724_v47  ;;  %841 = vst.msk [vmem:[#allocation2 + $0x78] sm:$0xff] %vm503_vm3, %v836_v48 }
 0x152   : > { %v705_v53 = vpop.f32.mrb[12].mxu0  ;;  %v817_v54 = vpop.f32.mrb[12].mxu1 }
 0x153   : > { %v725_v55 = vadd.f32 %v705_v53, %v624_v51  ;;  %v837_v56 = vadd.f32 %v817_v54, %v736_v52  ;;  %v1776_v57 = vpop.f32.mrb[13].mxu0  ;;  %v1823_v58 = vpop.f32.mrb[13].mxu1 }
 0x155   : > { %730 = vst.msk [vmem:[#allocation2 + $0x58] sm:$0xff] %vm503_vm3, %v725_v55  ;;  %842 = vst.msk [vmem:[#allocation2 + $0x80] sm:$0xff] %vm503_vm3, %v837_v56 }
 0x156   : > { %v710_v61 = vpop.f32.mrb[14].mxu0  ;;  %v822_v62 = vpop.f32.mrb[14].mxu1 }
 0x157   : > { %v726_v63 = vadd.f32 %v710_v61, %v625_v59  ;;  %v838_v0 = vadd.f32 %v822_v62, %v737_v60  ;;  %v1779_v1 = vpop.f32.mrb[15].mxu0  ;;  %v1826_v2 = vpop.f32.mrb[15].mxu1 }
 0x158   : > { %v1111_v34 = vld [vmem:[#allocation2 + $0x50] sm:$0xff] (!%p1489_p13)  ;;  %v1242_v35 = vld [vmem:[#allocation2 + $0x78] sm:$0xff] (!%p1489_p13) }
 0x159   : > { %731 = vst.msk [vmem:[#allocation2 + $0x60] sm:$0xff] %vm503_vm3, %v726_v63  ;;  %843 = vst.msk [vmem:[#allocation2 + $0x88] sm:$0xff] %vm503_vm3, %v838_v0  ;;  %1870 = vmatmul.mubr.msk.f32.vlgmr.msra.gmra.mrb[10].mxu0 (!%p1489_p13), %vm503_vm3, %v1111_v34  ;;  %1887 = vmatmul.mubr.msk.f32.vlgmr.msra.gmra.mrb[10].mxu1 (!%p1489_p13), %vm503_vm3, %v1242_v35 }
 0x15a   : > { %v715_v5 = vpop.f32.mrb[16].mxu0  ;;  %v827_v6 = vpop.f32.mrb[16].mxu1  ;;  %1872 = vmatprep.mubr.msk.f32.mxu0 (!%p1489_p13), %vm2123_vm5, %v2122_v21  ;;  %1889 = vmatprep.mubr.msk.f32.mxu1 (!%p1489_p13), %vm2123_vm5, %v2122_v21 }
 0x15b   : > { %v727_v7 = vadd.f32 %v715_v5, %v626_v3  ;;  %v839_v8 = vadd.f32 %v827_v6, %v738_v4  ;;  %v1782_v9 = vpop.f32.mrb[17].mxu0  ;;  %v1829_v10 = vpop.f32.mrb[17].mxu1  ;;  %849 = sbr.rel (%p1489_p13) target bundleno = 578 (0x242), region = 82 }
 0x15c   : > { %v1112_v36 = vld [vmem:[#allocation2 + $0x58] sm:$0xff] (!%p1489_p13)  ;;  %v1243_v37 = vld [vmem:[#allocation2 + $0x80] sm:$0xff] (!%p1489_p13) }
 0x15d   : > { %732 = vst.msk [vmem:[#allocation2 + $0x68] sm:$0xff] %vm503_vm3, %v727_v7  ;;  %844 = vst.msk [vmem:[#allocation2 + $0x90] sm:$0xff] %vm503_vm3, %v839_v8  ;;  %1873 = vmatmul.mubr.msk.f32.gmra.mrb[12].mxu0 (!%p1489_p13), %vm503_vm3, %v1112_v36  ;;  %1890 = vmatmul.mubr.msk.f32.gmra.mrb[12].mxu1 (!%p1489_p13), %vm503_vm3, %v1243_v37 }
 0x15e   : > { %v720_v13 = vpop.f32.mrb[18].mxu0  ;;  %v832_v14 = vpop.f32.mrb[18].mxu1  ;;  %1875 = vmatprep.mubr.msk.f32.mxu0 (!%p1489_p13), %vm2123_vm5, %v2122_v21  ;;  %1892 = vmatprep.mubr.msk.f32.mxu1 (!%p1489_p13), %vm2123_vm5, %v2122_v21 }
 0x15f   : > { %v728_v15 = vadd.f32 %v720_v13, %v627_v11  ;;  %v840_v16 = vadd.f32 %v832_v14, %v739_v12  ;;  %v1785_v17 = vpop.f32.mrb[19].mxu0  ;;  %v1832_v18 = vpop.f32.mrb[19].mxu1 }
 0x160   : > { %v1113_v38 = vld [vmem:[#allocation2 + $0x60] sm:$0xff] (!%p1489_p13)  ;;  %v1244_v39 = vld [vmem:[#allocation2 + $0x88] sm:$0xff] (!%p1489_p13) }
 0x161   : > { %733 = vst.msk [vmem:[#allocation2 + $0x70] sm:$0xf] %vm508_vm4, %v728_v15  ;;  %845 = vst.msk [vmem:[#allocation2 + $0x98] sm:$0xf] %vm508_vm4, %v840_v16  ;;  %1876 = vmatmul.mubr.msk.f32.gmra.mrb[14].mxu0 (!%p1489_p13), %vm503_vm3, %v1113_v38  ;;  %1893 = vmatmul.mubr.msk.f32.gmra.mrb[14].mxu1 (!%p1489_p13), %vm503_vm3, %v1244_v39 }
 0x162   : > { %1878 = vmatprep.mubr.msk.f32.mxu0 %vm2123_vm5, %v2122_v21  ;;  %1895 = vmatprep.mubr.msk.f32.mxu1 %vm2123_vm5, %v2122_v21 }
 0x164   : > { %v1114_v40 = vld [vmem:[#allocation2 + $0x68] sm:$0xff]  ;;  %v1245_v41 = vld [vmem:[#allocation2 + $0x90] sm:$0xff] }
 0x165   : > { %1879 = vmatmul.mubr.msk.f32.gmra.mrb[16].mxu0 %vm503_vm3, %v1114_v40  ;;  %1896 = vmatmul.mubr.msk.f32.gmra.mrb[16].mxu1 %vm503_vm3, %v1245_v41 }
 0x166   : > { %1881 = vmatprep.mubr.msk.f32.mxu0 %vm2123_vm5, %v2122_v21  ;;  %1898 = vmatprep.mubr.msk.f32.mxu1 %vm2123_vm5, %v2122_v21  ;;  %v1524_v21 = vld [vmem:[%s2612_s3 + $0x3] ss:$0 sm:$0xff] }
 0x168   : > { %v1115_v42 = vld [vmem:[#allocation2 + $0x70] sm:$0xf]  ;;  %v1246_v43 = vld [vmem:[#allocation2 + $0x98] sm:$0xf] }
 0x169   : > { %1882 = vmatmul.mubr.msk.f32.gmra.mrb[18].mxu0 %vm503_vm3, %v1115_v42  ;;  %1899 = vmatmul.mubr.msk.f32.gmra.mrb[18].mxu1 %vm503_vm3, %v1246_v43 }
 0x20e   : > { %v944_v46 = vpop.f32.mrb[0].mxu0  ;;  %v1076_v47 = vpop.f32.mrb[0].mxu1 }
 0x20f   : > { %v945_v48 = vadd.f32 %v1490_v44, %v944_v46  ;;  %v1077_v49 = vadd.f32 %v1498_v45, %v1076_v47  ;;  %v1837_v50 = vpop.f32.mrb[1].mxu0  ;;  %v1854_v51 = vpop.f32.mrb[1].mxu1 }
 0x211   : > { %v968_v52 = vmax.f32 %v945_v48, 0.0  ;;  %v1100_v53 = vmax.f32 %v1077_v49, 0.0 }
 0x212   : > { %v949_v54 = vpop.f32.mrb[2].mxu0  ;;  %v1081_v55 = vpop.f32.mrb[2].mxu1 }
 0x213   : > { %974 = vst.msk [vmem:[%s2259_s27] sm:$0xff] %vm973_vm6, %v968_v52  ;;  %1504 = vst.msk [vmem:[%s2259_s27 + $0x28] sm:$0xff] %vm973_vm6, %v1100_v53  ;;  %v950_v56 = vadd.f32 %v1490_v44, %v949_v54  ;;  %v1082_v57 = vadd.f32 %v1498_v45, %v1081_v55  ;;  %v1840_v58 = vpop.f32.mrb[3].mxu0  ;;  %v1857_v59 = vpop.f32.mrb[3].mxu1 }
 0x215   : > { %v969_v60 = vmax.f32 %v950_v56, 0.0  ;;  %v1101_v61 = vmax.f32 %v1082_v57, 0.0 }
 0x216   : > { %v954_v62 = vpop.f32.mrb[4].mxu0  ;;  %v1086_v63 = vpop.f32.mrb[4].mxu1 }
 0x217   : > { %975 = vst.msk [vmem:[%s2259_s27 + $0x8] sm:$0xff] %vm973_vm6, %v969_v60  ;;  %1505 = vst.msk [vmem:[%s2259_s27 + $0x30] sm:$0xff] %vm973_vm6, %v1101_v61  ;;  %v955_v0 = vadd.f32 %v1490_v44, %v954_v62  ;;  %v1087_v1 = vadd.f32 %v1498_v45, %v1086_v63  ;;  %v1843_v2 = vpop.f32.mrb[5].mxu0  ;;  %v1860_v3 = vpop.f32.mrb[5].mxu1 }
 0x219   : > { %v970_v4 = vmax.f32 %v955_v0, 0.0  ;;  %v1102_v5 = vmax.f32 %v1087_v1, 0.0 }
 0x21a   : > { %v959_v6 = vpop.f32.mrb[6].mxu0  ;;  %v1091_v7 = vpop.f32.mrb[6].mxu1 }
 0x21b   : > { %976 = vst.msk [vmem:[%s2259_s27 + $0x10] sm:$0xff] %vm973_vm6, %v970_v4  ;;  %1506 = vst.msk [vmem:[%s2259_s27 + $0x38] sm:$0xff] %vm973_vm6, %v1102_v5  ;;  %v960_v8 = vadd.f32 %v1490_v44, %v959_v6  ;;  %v1092_v9 = vadd.f32 %v1498_v45, %v1091_v7  ;;  %v1846_v10 = vpop.f32.mrb[7].mxu0  ;;  %v1863_v11 = vpop.f32.mrb[7].mxu1 }
 0x21d   : > { %v971_v12 = vmax.f32 %v960_v8, 0.0  ;;  %v1103_v13 = vmax.f32 %v1092_v9, 0.0 }
 0x21e   : > { %v964_v14 = vpop.f32.mrb[8].mxu0  ;;  %v1096_v15 = vpop.f32.mrb[8].mxu1 }
 0x21f   : > { %977 = vst.msk [vmem:[%s2259_s27 + $0x18] sm:$0xff] %vm973_vm6, %v971_v12  ;;  %1507 = vst.msk [vmem:[%s2259_s27 + $0x40] sm:$0xff] %vm973_vm6, %v1103_v13  ;;  %v965_v16 = vadd.f32 %v1490_v44, %v964_v14  ;;  %v1097_v17 = vadd.f32 %v1498_v45, %v1096_v15  ;;  %v1849_v18 = vpop.f32.mrb[9].mxu0  ;;  %v1866_v19 = vpop.f32.mrb[9].mxu1 }
 0x221   : > { %v972_v22 = vmax.f32 %v965_v16, 0.0  ;;  %v1104_v23 = vmax.f32 %v1097_v17, 0.0 }
 0x223   : > { %979 = vst.msk [vmem:[%s2259_s27 + $0x20] sm:$0xf] %vm978_vm7, %v972_v22  ;;  %1508 = vst.msk [vmem:[%s2259_s27 + $0x48] sm:$0xf] %vm978_vm7, %v1104_v23 }
 0x22c   : > { %v1207_v24 = vpop.f32.mrb[10].mxu0  ;;  %v1338_v25 = vpop.f32.mrb[10].mxu1 }
 0x22d   : > { %v1208_v26 = vadd.f32 %v1511_v20, %v1207_v24  ;;  %v1339_v27 = vadd.f32 %v1524_v21, %v1338_v25  ;;  %v1871_v28 = vpop.f32.mrb[11].mxu0  ;;  %v1888_v29 = vpop.f32.mrb[11].mxu1 }
 0x22f   : > { %v1231_v30 = vmax.f32 %v1208_v26, 0.0  ;;  %v1362_v31 = vmax.f32 %v1339_v27, 0.0 }
 0x230   : > { %v1212_v32 = vpop.f32.mrb[12].mxu0  ;;  %v1343_v33 = vpop.f32.mrb[12].mxu1 }
 0x231   : > { %1517 = vst.msk [vmem:[%s2259_s27 + $0x50] sm:$0xff] %vm973_vm6, %v1231_v30  ;;  %1530 = vst.msk [vmem:[%s2259_s27 + $0x78] sm:$0xff] %vm973_vm6, %v1362_v31  ;;  %v1213_v34 = vadd.f32 %v1511_v20, %v1212_v32  ;;  %v1344_v35 = vadd.f32 %v1524_v21, %v1343_v33  ;;  %v1874_v36 = vpop.f32.mrb[13].mxu0  ;;  %v1891_v37 = vpop.f32.mrb[13].mxu1 }
 0x233   : > { %v1232_v38 = vmax.f32 %v1213_v34, 0.0  ;;  %v1363_v39 = vmax.f32 %v1344_v35, 0.0 }
 0x234   : > { %v1217_v40 = vpop.f32.mrb[14].mxu0  ;;  %v1348_v41 = vpop.f32.mrb[14].mxu1 }
 0x235   : > { %1518 = vst.msk [vmem:[%s2259_s27 + $0x58] sm:$0xff] %vm973_vm6, %v1232_v38  ;;  %1531 = vst.msk [vmem:[%s2259_s27 + $0x80] sm:$0xff] %vm973_vm6, %v1363_v39  ;;  %v1218_v42 = vadd.f32 %v1511_v20, %v1217_v40  ;;  %v1349_v43 = vadd.f32 %v1524_v21, %v1348_v41  ;;  %v1877_v44 = vpop.f32.mrb[15].mxu0  ;;  %v1894_v45 = vpop.f32.mrb[15].mxu1 }
 0x237   : > { %v1233_v46 = vmax.f32 %v1218_v42, 0.0  ;;  %v1364_v47 = vmax.f32 %v1349_v43, 0.0 }
 0x238   : > { %v1222_v48 = vpop.f32.mrb[16].mxu0  ;;  %v1353_v49 = vpop.f32.mrb[16].mxu1 }
 0x239   : > { %1519 = vst.msk [vmem:[%s2259_s27 + $0x60] sm:$0xff] %vm973_vm6, %v1233_v46  ;;  %1532 = vst.msk [vmem:[%s2259_s27 + $0x88] sm:$0xff] %vm973_vm6, %v1364_v47  ;;  %v1223_v50 = vadd.f32 %v1511_v20, %v1222_v48  ;;  %v1354_v51 = vadd.f32 %v1524_v21, %v1353_v49  ;;  %v1880_v52 = vpop.f32.mrb[17].mxu0  ;;  %v1897_v53 = vpop.f32.mrb[17].mxu1 }
 0x23b   : > { %v1234_v54 = vmax.f32 %v1223_v50, 0.0  ;;  %v1365_v55 = vmax.f32 %v1354_v51, 0.0 }
 0x23c   : > { %v1227_v56 = vpop.f32.mrb[18].mxu0  ;;  %v1358_v57 = vpop.f32.mrb[18].mxu1 }
 0x23d   : > { %1520 = vst.msk [vmem:[%s2259_s27 + $0x68] sm:$0xff] %vm973_vm6, %v1234_v54  ;;  %1533 = vst.msk [vmem:[%s2259_s27 + $0x90] sm:$0xff] %vm973_vm6, %v1365_v55  ;;  %v1228_v58 = vadd.f32 %v1511_v20, %v1227_v56  ;;  %v1359_v59 = vadd.f32 %v1524_v21, %v1358_v57  ;;  %v1883_v60 = vpop.f32.mrb[19].mxu0  ;;  %v1900_v61 = vpop.f32.mrb[19].mxu1 }
 0x23f   : > { %v1235_v62 = vmax.f32 %v1228_v58, 0.0  ;;  %v1366_v63 = vmax.f32 %v1359_v59, 0.0 }
 0x241   : > { %1521 = vst.msk [vmem:[%s2259_s27 + $0x70] sm:$0xf] %vm978_vm7, %v1235_v62  ;;  %1534 = vst.msk [vmem:[%s2259_s27 + $0x98] sm:$0xf] %vm978_vm7, %v1366_v63 }
 0x242 PF: > { %s14_s21 = sadd.s32 1, %s2116_s21   ;;  %s2614_s15 = smov %s2096_s16 }
 0x243   : > { %p11_p0 = scmp.ge.s32.totalorder %s14_s21, 6   ;;  %s2615_s16 = smov %s2198_s26 }
 0x244   : > { %s2616_s17 = smov %s2108_s19  ;;  %s2617_s18 = smov %s2112_s20 }
 0x245   : > { %s2618_s19 = smov %s2621_s22  ;;  %s2619_s20 = smov %s2625_s23 }
 0x246   :  { %13 = sbr.rel (!%p11_p0) target bundleno = 4 (0x4), region = 135 }

</bundles_post_ra>
